<compile_context>
chip_gen: v6e
topology: v6e:2x2x1
jax: 0.10.0
libtpu: 0.0.40
codegen_flags: <defaults>
</compile_context>

<pallas_src>
import jax
import jax.numpy as jnp
from jax.experimental import pallas as pl
from jax.experimental.pallas import tpu as pltpu


def _round_up(n, m):
    return ((n + m - 1) // m) * m


def _pool_context_encoder_kernel(x_ref, w_ref, b_ref, gamma_ref, beta_ref,
                                 o_ref, acc_ref):
    s = pl.program_id(0)

    # ---- init running-max accumulator on the first sequence tile ----
    @pl.when(s == 0)
    def _():
        acc_ref[...] = jnp.full_like(acc_ref, -jnp.inf)

    # ---- per-tile max over the sequence axis (XLU sublane reduce) ----
    # Reduce in the input dtype (supports bf16 x to halve HBM traffic),
    # accumulate in f32.
    tile_max = jnp.max(x_ref[...], axis=1)                      # (B, D)
    acc_ref[...] = jnp.maximum(acc_ref[...], tile_max.astype(acc_ref.dtype))

    # ---- epilogue on the last tile: Linear -> BatchNorm1d (train) -> ReLU ----
    @pl.when(s == pl.num_programs(0) - 1)
    def _():
        h = acc_ref[...]                                        # (B, D) f32
        y = jnp.dot(h, w_ref[...].astype(jnp.float32),
                    preferred_element_type=jnp.float32) + b_ref[...]
        mean = jnp.mean(y, axis=0, keepdims=True)               # (1, Hp)
        diff = y - mean
        var = jnp.mean(diff * diff, axis=0, keepdims=True)      # biased variance
        y_bn = diff * jax.lax.rsqrt(var + 1e-5) * gamma_ref[...] + beta_ref[...]
        o_ref[...] = jnp.maximum(y_bn, 0.0).astype(o_ref.dtype)


def pool_context_encoder(x, w, b, gamma, beta, *, seq_tile=None):
    """x: (B, S, D) float; w: (D, H); b, gamma, beta: (1, H). Returns (B, H) f32.

    BatchNorm is evaluated in training mode (batch statistics) over the full
    batch B, so B is never tiled (it lives whole in each block).
    """
    B, S, D = x.shape
    Din, H = w.shape
    assert Din == D

    # ---- pad H to a multiple of 128: lane-dense output stores + native MXU N ----
    Hp = _round_up(H, 128)
    if Hp != H:
        pad_h = Hp - H
        w = jnp.pad(w, ((0, 0), (0, pad_h)))                    # zero cols -> y_pad = 0
        b = jnp.pad(b, ((0, 0), (0, pad_h)))
        gamma = jnp.pad(gamma, ((0, 0), (0, pad_h)), constant_values=1.0)
        beta = jnp.pad(beta, ((0, 0), (0, pad_h)))

    # ---- pick a sequence tile: ~4 MiB per buffer (double-buffered by Pallas),
    #      multiple of 8 sublanes, safe for v5e's 16 MiB scoped default and
    #      v7x's 64 MiB physical VMEM ----
    itemsize = jnp.dtype(x.dtype).itemsize
    if seq_tile is None:
        budget = 4 * 1024 * 1024
        ts = max(1, budget // (B * D * itemsize))
        ts = min(ts, S)
        ts = max(8, (ts // 8) * 8)
    else:
        ts = seq_tile

    # ---- pad S up to a multiple of the tile with -inf (identity for max) ----
    Sp = _round_up(S, ts)
    if Sp != S:
        x = jnp.pad(x, ((0, 0), (0, Sp - S), (0, 0)),
                    constant_values=-jnp.inf)
    num_tiles = Sp // ts

    # VMEM budget: 2x double-buffered x tiles + weights + accumulator + output,
    # with headroom.  Stays within every generation's scoped limits.
    vmem_limit = min(
        max(4 * (B * ts * D * itemsize) + 4 * (D * Hp * 4 + B * D * 4 + B * Hp * 4),
            16 * 1024 * 1024),
        32 * 1024 * 1024)

    out = pl.pallas_call(
        _pool_context_encoder_kernel,
        out_shape=jax.ShapeDtypeStruct((B, Hp), jnp.float32),
        grid_spec=pltpu.PrefetchScalarGridSpec(
            num_scalar_prefetch=0,
            grid=(num_tiles,),
            in_specs=[
                pl.BlockSpec((B, ts, D), lambda s: (0, s, 0)),   # pipelined x tiles
                pl.BlockSpec((D, Hp), lambda s: (0, 0)),
                pl.BlockSpec((1, Hp), lambda s: (0, 0)),
                pl.BlockSpec((1, Hp), lambda s: (0, 0)),
                pl.BlockSpec((1, Hp), lambda s: (0, 0)),
            ],
            out_specs=pl.BlockSpec((B, Hp), lambda s: (0, 0)),   # resident across grid
            scratch_shapes=[pltpu.VMEM((B, D), jnp.float32)],    # running max
        ),
        compiler_params=pltpu.CompilerParams(
            dimension_semantics=("arbitrary",),                  # S is a reduction axis
            vmem_limit_bytes=int(vmem_limit),
        ),
    )(x, w, b, gamma, beta)

    return out[:, :H]


if __name__ == "__main__":
    # Small shapes consistent with the module (input_size -> hidden_size).
    # Chosen to exercise both the sequence-tile padding (S=20) and the
    # H->128 lane padding (H=96).
    B, S, D, H = 8, 20, 256, 96

    key = jax.random.PRNGKey(0)
    k_x, k_w, k_b = jax.random.split(key, 3)

    x = jax.random.normal(k_x, (B, S, D), dtype=jnp.float32)

    # Parameters (linear.weight ~ N(0, 0.01), stored transposed as (D, H);
    # bn.weight = 1, bn.bias = 0 as in nn.BatchNorm1d defaults).
    w = (0.01 * jax.random.normal(k_w, (H, D), dtype=jnp.float32)).T   # (D, H)
    b = 0.01 * jax.random.normal(k_b, (1, H), dtype=jnp.float32)
    gamma = jnp.ones((1, H), dtype=jnp.float32)
    beta = jnp.zeros((1, H), dtype=jnp.float32)

    out = pool_context_encoder(x, w, b, gamma, beta)
    out = jax.block_until_ready(out)

    # Reference in plain JAX (same semantics as the PyTorch module in train()).
    h_ref = jnp.max(x, axis=1)
    y_ref = h_ref @ w + b
    mu = jnp.mean(y_ref, axis=0, keepdims=True)
    var = jnp.mean((y_ref - mu) ** 2, axis=0, keepdims=True)
    ref = jnp.maximum((y_ref - mu) * jax.lax.rsqrt(var + 1e-5) * gamma + beta, 0.0)

    assert out.shape == (B, H)
    assert jnp.allclose(out, ref, atol=1e-5, rtol=1e-5)

    print("KERNEL_OK")
</pallas_src>

<mosaic_0001>
module attributes {stable_mosaic.version = 11 : i64} {
  func.func @_pool_context_encoder_kernel(%arg0: i32, %arg1: memref<8x16x256xf32, #tpu.memory_space<vmem>>, %arg2: memref<256x128xf32, #tpu.memory_space<vmem>>, %arg3: memref<1x128xf32, #tpu.memory_space<vmem>>, %arg4: memref<1x128xf32, #tpu.memory_space<vmem>>, %arg5: memref<1x128xf32, #tpu.memory_space<vmem>>, %arg6: memref<8x128xf32, #tpu.memory_space<vmem>>, %arg7: memref<8x256xf32, #tpu.memory_space<vmem>>) attributes {dimension_semantics = [#tpu.dimension_semantics<arbitrary>], iteration_bounds = array<i64: 2>, scalar_prefetch = 0 : i64, scratch_operands = 1 : i64, tpu.core_type = #tpu.core_type<tc>, window_params = [{transform_indices = @transform_0, window_bounds = array<i64: 8, 16, 256>}, {pipeline_mode = #tpu.pipeline_mode<synchronous>, transform_indices = @transform_1, window_bounds = array<i64: 256, 128>}, {pipeline_mode = #tpu.pipeline_mode<synchronous>, transform_indices = @transform_2, window_bounds = array<i64: 1, 128>}, {pipeline_mode = #tpu.pipeline_mode<synchronous>, transform_indices = @transform_3, window_bounds = array<i64: 1, 128>}, {pipeline_mode = #tpu.pipeline_mode<synchronous>, transform_indices = @transform_4, window_bounds = array<i64: 1, 128>}, {pipeline_mode = #tpu.pipeline_mode<synchronous>, transform_indices = @transform_5, window_bounds = array<i64: 8, 128>}]} {
    %c0_i32 = arith.constant 0 : i32
    %0 = arith.cmpi eq, %arg0, %c0_i32 : i32
    %1 = arith.extui %0 : i1 to i32
    %c0_i32_0 = arith.constant 0 : i32
    %2 = arith.cmpi ne, %1, %c0_i32_0 : i32
    scf.if %2 {
      %cst_8 = arith.constant 0xFF800000 : f32
      %11 = vector.broadcast %cst_8 : f32 to vector<8x256xf32>
      %c0_9 = arith.constant 0 : index
      %c0_10 = arith.constant 0 : index
      %12 = vector.load %arg7[%c0_9, %c0_10] : memref<8x256xf32, #tpu.memory_space<vmem>>, vector<8x256xf32>
      tpu.vector_store %arg7[%c0_9, %c0_10], %11 {strides = array<i32>} : memref<8x256xf32, #tpu.memory_space<vmem>>, vector<8x256xf32>,
    } else {
    }
    %c0 = arith.constant 0 : index
    %c0_1 = arith.constant 0 : index
    %c0_2 = arith.constant 0 : index
    %3 = vector.load %arg1[%c0, %c0_1, %c0_2] : memref<8x16x256xf32, #tpu.memory_space<vmem>>, vector<8x16x256xf32>
    %cst = arith.constant dense<0xFF800000> : vector<8x256xf32>
    %4 = vector.multi_reduction <maximumf>, %3, %cst [1] : vector<8x16x256xf32> to vector<8x256xf32>
    %c0_3 = arith.constant 0 : index
    %c0_4 = arith.constant 0 : index
    %5 = vector.load %arg7[%c0_3, %c0_4] : memref<8x256xf32, #tpu.memory_space<vmem>>, vector<8x256xf32>
    %6 = arith.maximumf %5, %4 : vector<8x256xf32>
    %c0_5 = arith.constant 0 : index
    %c0_6 = arith.constant 0 : index
    %7 = vector.load %arg7[%c0_5, %c0_6] : memref<8x256xf32, #tpu.memory_space<vmem>>, vector<8x256xf32>
    tpu.vector_store %arg7[%c0_5, %c0_6], %6 {strides = array<i32>} : memref<8x256xf32, #tpu.memory_space<vmem>>, vector<8x256xf32>,
    %c1_i32 = arith.constant 1 : i32
    %8 = arith.cmpi eq, %arg0, %c1_i32 : i32
    %9 = arith.extui %8 : i1 to i32
    %c0_i32_7 = arith.constant 0 : i32
    %10 = arith.cmpi ne, %9, %c0_i32_7 : i32
    scf.if %10 {
      %c0_8 = arith.constant 0 : index
      %c0_9 = arith.constant 0 : index
      %11 = vector.load %arg7[%c0_8, %c0_9] : memref<8x256xf32, #tpu.memory_space<vmem>>, vector<8x256xf32>
      %c0_10 = arith.constant 0 : index
      %c0_11 = arith.constant 0 : index
      %12 = vector.load %arg2[%c0_10, %c0_11] : memref<256x128xf32, #tpu.memory_space<vmem>>, vector<256x128xf32>
      %cst_12 = arith.constant dense<0.000000e+00> : vector<8x128xf32>
      %13 = tpu.matmul %11, %12, %cst_12 {dimension_numbers = #tpu.dot_dimension_numbers<[1], [0], [0], [1], [0, 0, 1, 1], [], []>} : vector<8x256xf32>, vector<256x128xf32>, vector<8x128xf32> -> vector<8x128xf32>
      %c0_13 = arith.constant 0 : index
      %c0_14 = arith.constant 0 : index
      %14 = vector.load %arg3[%c0_13, %c0_14] : memref<1x128xf32, #tpu.memory_space<vmem>>, vector<1x128xf32>
      %15 = vector.broadcast %14 : vector<1x128xf32> to vector<8x128xf32>
      %16 = arith.addf %13, %15 : vector<8x128xf32>
      %cst_15 = arith.constant dense<0.000000e+00> : vector<128xf32>
      %17 = vector.multi_reduction <add>, %16, %cst_15 [0] : vector<8x128xf32> to vector<128xf32>
      %18 = vector.shape_cast %17 : vector<128xf32> to vector<1x128xf32>
      %cst_16 = arith.constant 8.000000e+00 : f32
      %19 = vector.broadcast %cst_16 : f32 to vector<1x128xf32>
      %20 = arith.divf %18, %19 : vector<1x128xf32>
      %21 = vector.broadcast %20 : vector<1x128xf32> to vector<8x128xf32>
      %22 = arith.subf %16, %21 : vector<8x128xf32>
      %23 = arith.mulf %22, %22 : vector<8x128xf32>
      %cst_17 = arith.constant dense<0.000000e+00> : vector<128xf32>
      %24 = vector.multi_reduction <add>, %23, %cst_17 [0] : vector<8x128xf32> to vector<128xf32>
      %25 = vector.shape_cast %24 : vector<128xf32> to vector<1x128xf32>
      %cst_18 = arith.constant 8.000000e+00 : f32
      %26 = vector.broadcast %cst_18 : f32 to vector<1x128xf32>
      %27 = arith.divf %25, %26 : vector<1x128xf32>
      %cst_19 = arith.constant 9.99999974E-6 : f32
      %28 = vector.broadcast %cst_19 : f32 to vector<1x128xf32>
      %29 = arith.addf %27, %28 : vector<1x128xf32>
      %30 = math.rsqrt %29 : vector<1x128xf32>
      %31 = vector.broadcast %30 : vector<1x128xf32> to vector<8x128xf32>
      %32 = arith.mulf %22, %31 : vector<8x128xf32>
      %c0_20 = arith.constant 0 : index
      %c0_21 = arith.constant 0 : index
      %33 = vector.load %arg4[%c0_20, %c0_21] : memref<1x128xf32, #tpu.memory_space<vmem>>, vector<1x128xf32>
      %34 = vector.broadcast %33 : vector<1x128xf32> to vector<8x128xf32>
      %35 = arith.mulf %32, %34 : vector<8x128xf32>
      %c0_22 = arith.constant 0 : index
      %c0_23 = arith.constant 0 : index
      %36 = vector.load %arg5[%c0_22, %c0_23] : memref<1x128xf32, #tpu.memory_space<vmem>>, vector<1x128xf32>
      %37 = vector.broadcast %36 : vector<1x128xf32> to vector<8x128xf32>
      %38 = arith.addf %35, %37 : vector<8x128xf32>
      %cst_24 = arith.constant 0.000000e+00 : f32
      %39 = vector.broadcast %cst_24 : f32 to vector<8x128xf32>
      %40 = arith.maximumf %38, %39 : vector<8x128xf32>
      %c0_25 = arith.constant 0 : index
      %c0_26 = arith.constant 0 : index
      %41 = vector.load %arg6[%c0_25, %c0_26] : memref<8x128xf32, #tpu.memory_space<vmem>>, vector<8x128xf32>
      tpu.vector_store %arg6[%c0_25, %c0_26], %40 {strides = array<i32>} : memref<8x128xf32, #tpu.memory_space<vmem>>, vector<8x128xf32>,
    } else {
    }
    return
  }
  func.func @transform_0(%arg0: i32) -> (i32, i32, i32) {
    %c0_i32 = arith.constant 0 : i32
    %c0_i32_0 = arith.constant 0 : i32
    %c0_i32_1 = arith.constant 0 : i32
    return %c0_i32, %arg0, %c0_i32_0 : i32, i32, i32
  }
  func.func @transform_1(%arg0: i32) -> (i32, i32) {
    %c0_i32 = arith.constant 0 : i32
    %c0_i32_0 = arith.constant 0 : i32
    %c0_i32_1 = arith.constant 0 : i32
    return %c0_i32, %c0_i32_0 : i32, i32
  }
  func.func @transform_2(%arg0: i32) -> (i32, i32) {
    %c0_i32 = arith.constant 0 : i32
    %c0_i32_0 = arith.constant 0 : i32
    %c0_i32_1 = arith.constant 0 : i32
    return %c0_i32, %c0_i32_0 : i32, i32
  }
  func.func @transform_3(%arg0: i32) -> (i32, i32) {
    %c0_i32 = arith.constant 0 : i32
    %c0_i32_0 = arith.constant 0 : i32
    %c0_i32_1 = arith.constant 0 : i32
    return %c0_i32, %c0_i32_0 : i32, i32
  }
  func.func @transform_4(%arg0: i32) -> (i32, i32) {
    %c0_i32 = arith.constant 0 : i32
    %c0_i32_0 = arith.constant 0 : i32
    %c0_i32_1 = arith.constant 0 : i32
    return %c0_i32, %c0_i32_0 : i32, i32
  }
  func.func @transform_5(%arg0: i32) -> (i32, i32) {
    %c0_i32 = arith.constant 0 : i32
    %c0_i32_0 = arith.constant 0 : i32
    %c0_i32_1 = arith.constant 0 : i32
    return %c0_i32, %c0_i32_0 : i32, i32
  }
}

</mosaic_0001>

<bundles_post_ra>
// kernel: tpu_custom_call.1
= control target key start
LH: loop header
LB: loop body
LE: loop exit
PB: predicated region body
PF: predicated region fallthrough
CT: control target
= control target key end

     0   :  { %10 = vsyncpa [#allocation4], 0  ;;  %s1153_s0 = inlined_call_operand.hbm [shape: f32[8,32,256], index: 0, kind: input, shape index: {}]   ;;  %s1154_s1 = inlined_call_operand.hbm [shape: f32[256,128], index: 1, kind: input, shape index: {}]   ;;  %s1155_s2 = inlined_call_operand.vmem [shape: f32[1,128], index: 2, kind: input, shape index: {}]   ;;  %s1156_s3 = inlined_call_operand.vmem [shape: f32[1,128], index: 3, kind: input, shape index: {}]   ;;  %s1157_s4 = inlined_call_operand.vmem [shape: f32[1,128], index: 4, kind: input, shape index: {}]   ;;  %s1158_s5 = inlined_call_operand.hbm [shape: f32[8,128], index: 5, kind: output, shape index: {}]  }
   0x1   :  { %12 = vsyncpa [#allocation4 + $0x1], 0 }
   0x2   :  { %13 = vsyncpa [#allocation7], 0 }
   0x3   :  { %14 = vsyncpa [#allocation5], 0  ;;  %s952_s18 = smov 0   ;;  %s954_s19 = smov 0  }
   0x4   :  { %s956_s20 = smov 0   ;;  %s958_s21 = smov 0  }
   0x5 LB: > { %s971_s22 = sadd.s32 4294967295, %s909_s21   ;;  %s974_s23 = sadd.s32 1, %s909_s21   ;;  %s909_s21 = sphi %s958_s21, %s1168_s21   ;;  %s905_s20 = sphi %s956_s20, %s1167_s20   ;;  %s901_s19 = sphi %s954_s19, %s1166_s19   ;;  %s897_s18 = sphi %s952_s18, %s1165_s18  }
   0x6   : > { %s24_s24 = ssub.s32 %s909_s21, %s974_s23  ;;  %s27_s25 = sadd.s32 1, %s905_s20 }
   0x7   : > { %p25_p0 = scmp.eq.s32.totalorder %s24_s24, 0  ;;  %p34_p1 = scmp.ne.s32.totalorder %s905_s20, %s901_s19 }
   0x8   : > { %p35_p2 = scmp.eq.s32.totalorder %s909_s21, 0  ;;  %p40_p3 = scmp.ne.s32.totalorder %s901_s19, %s897_s18 }
   0x9   : > { %s984_s26 = scalar_select %p25_p0, %s905_s20, %s27_s25  }
   0xa   : > { %p986_p4 = por %p35_p2, %p34_p1  ;;  %p41_p5 = scmp.eq.s32.totalorder %s971_s22, 0 }
   0xb   : > { %p689_p6 = scmp.ge.s32.totalorder %s909_s21, 1  ;;  %p156_p7 = scmp.lt.s32.totalorder %s909_s21, 3 }
   0xc   : > { %p995_p8 = por %p41_p5, %p40_p3  ;;  %s911_s30 = smov [#allocation6]  }
   0xd   : > { %p1000_p10 = pnand %p689_p6, %p156_p7  ;;  %s168_s6 = sshll.u32 %s911_s30, 4  ;;  %s169_s6 = int_to_ptr.vmem [resolvable:$true] %s168_s6 }
   0xe   : > { %s1161_s28 = scalar_select %p995_p8, 1, 0 }
   0xf   : > { %p764_p11 = pneg %p1000_p10  ;;  %s828_s7 = scalar_lea.vmem %s169_s6, 4096 }
  0x10   : > { %p829_p0 = scmp.ne.s32.totalorder %s169_s6, %s828_s7  ;;  %p836_p3 = scmp.lt.s32.totalorder %s169_s6, %s169_s6 }
  0x11   : > { %p765_p12 = pnand %p764_p11, %p41_p5  ;;  %p837_p8 = scmp.lt.s32.totalorder %s828_s7, %s828_s7 }
  0x13   : > { %p819_p13 = pneg %p765_p12  ;;  %p838_p9 = por %p837_p8, %p836_p3 }
  0x15   : > { %p831_p1 = pnand %p829_p0, %p819_p13 }
  0x17   : > { %p832_p2 = pneg %p831_p1 }
  0x19   : > { %p839_p6 = pnand %p838_p9, %p832_p2 }
  0x1b   : > { %842 = shalt.err (!%p839_p6)
}
  0x1c   : > { %s912_s8 = smov 128   ;;  %s913_s9 = smov 8  }
  0x1d   : > { %767 = dma.hbm_to_vmem [thread:$0]  (!%p765_p12), %s1154_s1, 4096, %s169_s6, [#allocation7], %s912_s8, %s912_s8, %s913_s9  }
  0x1e   : > { %p691_p7 = scmp.ge.s32.totalorder %s909_s21, 2 }
  0x20   : > { %187 = sbr.rel (%p691_p7) target bundleno = 50 (0x32), region = 32 }
  0x25   : > { %s191_s12 = sand.u32 1, %s905_s20   ;;  %s711_s13 = sshll.u32 %s909_s21, 9 }
  0x26   : > { %s692_s14 = sshll.u32 %s191_s12, 8  ;;  %s202_s17 = scalar_lea.hbm %s1153_s0, %s711_s13 }
  0x27   : > { %s749_s18 = scalar_select %p986_p4, [#allocation0], [#allocation11] }
  0x28   : > { %s195_s24 = scalar_lea.vmem [#allocation3], %s692_s14  ;;  %s914_s6 = smov 1024  }
  0x29   : > { %s215_s25 = sshll.u32 %s195_s24, 4  ;;  %s207_s30 = sld [smem:[%s749_s18]]   ;;  %s216_s25 = int_to_ptr.vmem [resolvable:$true] %s215_s25 }
  0x2a   : > { %750 = sst [smem:[#allocation10]] (%p986_p4), %s914_s6  ;;  %s915_s7 = smov 512  }
  0x2b   : > { %751 = sst [smem:[#allocation10 + $0x1]] (%p986_p4), %s915_s7  ;;  %s916_s21 = smov 2  }
  0x2c   : > { %752 = sst [smem:[#allocation10 + $0x2]] (%p986_p4), %s916_s21  ;;  %s917_s8 = smov 256  }
  0x2d   : > { %753 = sst [smem:[#allocation10 + $0x3]] (%p986_p4), %s917_s8  ;;  %s918_s10 = smov 16  }
  0x2e   : > { %754 = sst [smem:[#allocation10 + $0x4]] (%p986_p4), %s917_s8  ;;  %s192_s13 = scalar_lea.sflag [#allocation4], %s191_s12 }
  0x2f   : > { %s696_s9 = sshll.u32 %s207_s30, 26  ;;  %755 = sst [smem:[#allocation10 + $0x5]] (%p986_p4), %s918_s10 }
  0x30   : > { %s697_s11 = sadd.s32 134217728, %s696_s9  ;;  %s919_s14 = smov 131072  }
  0x31   : > { %756 = dma.general (%p986_p4), %s202_s17, 4096, %s216_s25, %s192_s13, %s919_s14, [#allocation10], %s697_s11, 0  }
  0x32 PF: > { %240 = sbr.rel (%p1000_p10) target bundleno = 411 (0x19b), region = 40  ;;  %s242_s15 = sand.u32 (!%p1000_p10), 1, %s901_s19  }
  0x33   : > { %s699_s16 = sshll.u32 (!%p1000_p10), %s242_s15, 8  ;;  %s243_s18 = scalar_lea.sflag (!%p1000_p10), [#allocation4], %s242_s15 }
  0x34   : > { %s1036_s24 = scalar_lea.vmem (!%p1000_p10), [#allocation3], %s699_s16  ;;  %p1163_p8 = scmp.ne.s32.totalorder (!%p1000_p10), %s1161_s28, 0 }
  0x37   : > { %884 = dma.done.wait (%p1163_p8), %s243_s18, 4096  }
  0x38   : > { %886 = vsyncadd (%p1163_p8), %s243_s18, 4294963200 }
  0x39   : > { %888 = dma.done.wait (%p41_p5), [#allocation7], 4096  }
  0x3a   : > { %890 = vsyncadd (%p41_p5), [#allocation7], 4294963200  ;;  %p1164_p4 = scmp.ne.s32.totalorder %s971_s22, 0 }
  0x3c   : > { %276 = sbr.rel (%p1164_p4) target bundleno = 67 (0x43), region = 52 }
  0x41   : > { %v920_v0 = vmov -inf  }
  0x42   : > { %277 = vst [vmem:[#allocation2] sm:$0xff] %v920_v0  ;;  %278 = vst [vmem:[#allocation2 + $0x8] sm:$0xff] %v920_v0 }
  0x43 PF: > { %v279_v1 = vld [vmem:[%s1036_s24] sm:$0xff]  ;;  %v280_v2 = vld [vmem:[%s1036_s24 + $0x8] sm:$0xff]  ;;  %v281_v3 = vld [vmem:[%s1036_s24 + $0x10] sm:$0xff]  ;;  %vm441_vm0 = vcmask 1041409   ;;  %vm443_vm1 = vcmask 1042434   ;;  %vm445_vm2 = vcmask 1043459  }
  0x44   : > { %v282_v4 = vld [vmem:[%s1036_s24 + $0x18] sm:$0xff]  ;;  %v283_v5 = vld [vmem:[%s1036_s24 + $0x20] sm:$0xff]  ;;  %v284_v6 = vld [vmem:[%s1036_s24 + $0x28] sm:$0xff]  ;;  %v311_v7 = vmax.f32 %v279_v1, %v281_v3  ;;  %vm447_vm3 = vcmask 1044484   ;;  %vm449_vm4 = vcmask 1045509   ;;  %vm451_vm5 = vcmask 1046534  }
  0x45   : > { %v285_v8 = vld [vmem:[%s1036_s24 + $0x30] sm:$0xff]  ;;  %v286_v9 = vld [vmem:[%s1036_s24 + $0x38] sm:$0xff]  ;;  %v287_v10 = vld [vmem:[%s1036_s24 + $0x40] sm:$0xff]  ;;  %v318_v11 = vmax.f32 %v280_v2, %v282_v4  ;;  %vm453_vm6 = vcmask 1047559   ;;  %p702_p5 = scmp.ne.s32.totalorder %s971_s22, 1 }
  0x46   : > { %v288_v12 = vld [vmem:[%s1036_s24 + $0x48] sm:$0xff]  ;;  %v289_v13 = vld [vmem:[%s1036_s24 + $0x50] sm:$0xff]  ;;  %v290_v14 = vld [vmem:[%s1036_s24 + $0x58] sm:$0xff]  ;;  %v312_v15 = vrot.slane %v311_v7, 4  ;;  %v325_v16 = vmax.f32 %v283_v5, %v285_v8  ;;  %v332_v17 = vmax.f32 %v284_v6, %v286_v9 }
  0x47   : > { %v291_v18 = vld [vmem:[%s1036_s24 + $0x60] sm:$0xff]  ;;  %v292_v19 = vld [vmem:[%s1036_s24 + $0x68] sm:$0xff]  ;;  %v293_v20 = vld [vmem:[%s1036_s24 + $0x70] sm:$0xff]  ;;  %v319_v21 = vrot.slane %v318_v11, 4  ;;  %v339_v22 = vmax.f32 %v287_v10, %v289_v13  ;;  %v346_v23 = vmax.f32 %v288_v12, %v290_v14 }
  0x48   : > { %v294_v24 = vld [vmem:[%s1036_s24 + $0x78] sm:$0xff]  ;;  %v313_v25 = vmax.f32 %v311_v7, %v312_v15  ;;  %v326_v26 = vrot.slane %v325_v16, 4  ;;  %v333_v27 = vrot.slane %v332_v17, 4  ;;  %v353_v28 = vmax.f32 %v291_v18, %v293_v20  ;;  %v295_v53 = vld [vmem:[%s1036_s24 + $0x80] sm:$0xff]  ;;  %v296_v54 = vld [vmem:[%s1036_s24 + $0x88] sm:$0xff] }
  0x49   : > { %v320_v29 = vmax.f32 %v318_v11, %v319_v21  ;;  %v340_v30 = vrot.slane %v339_v22, 4  ;;  %v347_v31 = vrot.slane %v346_v23, 4  ;;  %v360_v32 = vmax.f32 %v292_v19, %v294_v24  ;;  %v297_v55 = vld [vmem:[%s1036_s24 + $0x90] sm:$0xff]  ;;  %v298_v60 = vld [vmem:[%s1036_s24 + $0x98] sm:$0xff]  ;;  %v299_v61 = vld [vmem:[%s1036_s24 + $0xa0] sm:$0xff] }
  0x4a   : > { %v314_v33 = vrot.slane %v313_v25, 2  ;;  %v327_v34 = vmax.f32 %v325_v16, %v326_v26  ;;  %v334_v35 = vmax.f32 %v332_v17, %v333_v27  ;;  %v354_v36 = vrot.slane %v353_v28, 4  ;;  %v300_v62 = vld [vmem:[%s1036_s24 + $0xa8] sm:$0xff]  ;;  %v301_v2 = vld [vmem:[%s1036_s24 + $0xb0] sm:$0xff]  ;;  %v302_v3 = vld [vmem:[%s1036_s24 + $0xb8] sm:$0xff] }
  0x4b   : > { %v321_v37 = vrot.slane %v320_v29, 2  ;;  %v341_v38 = vmax.f32 %v339_v22, %v340_v30  ;;  %v348_v39 = vmax.f32 %v346_v23, %v347_v31  ;;  %v361_v40 = vrot.slane %v360_v32, 4  ;;  %v303_v4 = vld [vmem:[%s1036_s24 + $0xc0] sm:$0xff]  ;;  %v304_v8 = vld [vmem:[%s1036_s24 + $0xc8] sm:$0xff]  ;;  %v305_v9 = vld [vmem:[%s1036_s24 + $0xd0] sm:$0xff] }
  0x4c   : > { %v315_v41 = vmax.f32 %v313_v25, %v314_v33  ;;  %v328_v42 = vrot.slane %v327_v34, 2  ;;  %v335_v43 = vrot.slane %v334_v35, 2  ;;  %v355_v44 = vmax.f32 %v353_v28, %v354_v36  ;;  %v306_v10 = vld [vmem:[%s1036_s24 + $0xd8] sm:$0xff]  ;;  %v307_v15 = vld [vmem:[%s1036_s24 + $0xe0] sm:$0xff]  ;;  %v309_v16 = vld [vmem:[%s1036_s24 + $0xf0] sm:$0xff] }
  0x4d   : > { %v322_v45 = vmax.f32 %v320_v29, %v321_v37  ;;  %v342_v46 = vrot.slane %v341_v38, 2  ;;  %v349_v47 = vrot.slane %v348_v39, 2  ;;  %v362_v48 = vmax.f32 %v360_v32, %v361_v40  ;;  %v308_v21 = vld [vmem:[%s1036_s24 + $0xe8] sm:$0xff]  ;;  %v310_v22 = vld [vmem:[%s1036_s24 + $0xf8] sm:$0xff] }
  0x4e   : > { %v316_v49 = vrot.slane %v315_v41, 1  ;;  %v329_v50 = vmax.f32 %v327_v34, %v328_v42  ;;  %v336_v51 = vmax.f32 %v334_v35, %v335_v43  ;;  %v356_v52 = vrot.slane %v355_v44, 2 }
  0x4f   : > { %v323_v56 = vrot.slane %v322_v45, 1  ;;  %v343_v57 = vmax.f32 %v341_v38, %v342_v46  ;;  %v350_v58 = vmax.f32 %v348_v39, %v349_v47  ;;  %v363_v59 = vrot.slane %v362_v48, 2 }
  0x50   : > { %v330_v63 = vrot.slane %v329_v50, 1  ;;  %v337_v0 = vrot.slane %v336_v51, 1  ;;  %v1070_v1 = vmax.f32 %v355_v44, %v356_v52  ;;  %v1080_v11 = vmax.f32 %v315_v41, %v316_v49 }
  0x51   : > { %v344_v5 = vrot.slane %v343_v57, 1  ;;  %v351_v6 = vrot.slane %v350_v58, 1  ;;  %v1075_v7 = vmax.f32 %v362_v48, %v363_v59  ;;  %v1082_v12 = vmax.f32 %v322_v45, %v323_v56 }
  0x52   : > { %v1084_v13 = vmax.f32 %v329_v50, %v330_v63  ;;  %v367_v14 = vmax.f32 %v295_v53, %v297_v55  ;;  %v1088_v17 = vmax.f32 %v336_v51, %v337_v0  ;;  %v358_v19 = vrot.slane %v1070_v1, 1 }
  0x53   : > { %v1090_v18 = vmax.f32 %v343_v57, %v344_v5  ;;  %v374_v20 = vmax.f32 %v296_v54, %v298_v60  ;;  %v1095_v23 = vmax.f32 %v350_v58, %v351_v6  ;;  %v381_v25 = vmax.f32 %v299_v61, %v301_v2 }
  0x54   : > { %v368_v24 = vrot.slane %v367_v14, 4  ;;  %v388_v26 = vmax.f32 %v300_v62, %v302_v3  ;;  %v365_v27 = vrot.slane %v1075_v7, 1  ;;  %v395_v29 = vmax.f32 %v303_v4, %v305_v9 }
  0x55   : > { %v375_v28 = vrot.slane %v374_v20, 4  ;;  %v402_v30 = vmax.f32 %v304_v8, %v306_v10  ;;  %v382_v32 = vrot.slane %v381_v25, 4  ;;  %v409_v34 = vmax.f32 %v307_v15, %v309_v16 }
  0x56   : > { %v369_v31 = vmax.f32 %v367_v14, %v368_v24  ;;  %v389_v33 = vrot.slane %v388_v26, 4  ;;  %v396_v36 = vrot.slane %v395_v29, 4  ;;  %v416_v38 = vmax.f32 %v308_v21, %v310_v22 }
  0x57   : > { %v376_v35 = vmax.f32 %v374_v20, %v375_v28  ;;  %v403_v37 = vrot.slane %v402_v30, 4  ;;  %v383_v40 = vmax.f32 %v381_v25, %v382_v32  ;;  %v410_v42 = vrot.slane %v409_v34, 4 }
  0x58   : > { %v370_v39 = vrot.slane %v369_v31, 2  ;;  %v390_v41 = vmax.f32 %v388_v26, %v389_v33  ;;  %v397_v44 = vmax.f32 %v395_v29, %v396_v36  ;;  %v417_v46 = vrot.slane %v416_v38, 4 }
  0x59   : > { %v377_v43 = vrot.slane %v376_v35, 2  ;;  %v404_v45 = vmax.f32 %v402_v30, %v403_v37  ;;  %v384_v48 = vrot.slane %v383_v40, 2  ;;  %v411_v50 = vmax.f32 %v409_v34, %v410_v42 }
  0x5a   : > { %v371_v47 = vmax.f32 %v369_v31, %v370_v39  ;;  %v391_v49 = vrot.slane %v390_v41, 2  ;;  %v398_v52 = vrot.slane %v397_v44, 2  ;;  %v418_v54 = vmax.f32 %v416_v38, %v417_v46  ;;  %v424_v31 = vld [vmem:[#allocation2 + $0x8] sm:$0xff] }
  0x5b   : > { %v378_v51 = vmax.f32 %v376_v35, %v377_v43  ;;  %v405_v53 = vrot.slane %v404_v45, 2  ;;  %v385_v56 = vmax.f32 %v383_v40, %v384_v48  ;;  %v412_v58 = vrot.slane %v411_v50, 2 }
  0x5c   : > { %v372_v55 = vrot.slane %v371_v47, 1  ;;  %v392_v57 = vmax.f32 %v390_v41, %v391_v49  ;;  %v399_v60 = vmax.f32 %v397_v44, %v398_v52  ;;  %v419_v62 = vrot.slane %v418_v54, 2 }
  0x5d   : > { %v379_v59 = vrot.slane %v378_v51, 1  ;;  %v406_v61 = vmax.f32 %v404_v45, %v405_v53  ;;  %v359_v63 = vmax.f32 %v1070_v1, %v358_v19  ;;  %v386_v0 = vrot.slane %v385_v56, 1 }
  0x5e   : > { %v393_v2 = vrot.slane %v392_v57, 1  ;;  %v413_v3 = vmax.f32 %v411_v50, %v412_v58  ;;  %v373_v4 = vmax.f32 %v371_v47, %v372_v55  ;;  %v400_v5 = vrot.slane %v399_v60, 1 }
  0x5f   : > { %v407_v6 = vrot.slane %v406_v61, 1  ;;  %v420_v8 = vmax.f32 %v418_v54, %v419_v62  ;;  %v366_v9 = vmax.f32 %v1075_v7, %v365_v27  ;;  %v387_v10 = vmax.f32 %v385_v56, %v386_v0  ;;  %v423_v27 = vld [vmem:[#allocation2] sm:$0xff] }
  0x60   : > { %v414_v14 = vrot.slane %v413_v3, 1  ;;  %v442_v15 = vsel %vm441_vm0, %v1084_v13, %v1080_v11  ;;  %v380_v16 = vmax.f32 %v378_v51, %v379_v59  ;;  %v401_v20 = vmax.f32 %v399_v60, %v400_v5 }
  0x61   : > { %v421_v21 = vrot.slane %v420_v8, 1  ;;  %v444_v1 = vsel %vm443_vm1, %v1090_v18, %v442_v15  ;;  %v394_v19 = vmax.f32 %v392_v57, %v393_v2  ;;  %v455_v7 = vsel %vm441_vm0, %v1088_v17, %v1082_v12 }
  0x62   : > { %v415_v22 = vmax.f32 %v413_v3, %v414_v14  ;;  %v446_v24 = vsel %vm445_vm2, %v359_v63, %v444_v1  ;;  %v408_v25 = vmax.f32 %v406_v61, %v407_v6  ;;  %v456_v11 = vsel %vm443_vm1, %v1095_v23, %v455_v7 }
  0x63   : > { %v448_v26 = vsel %vm447_vm3, %v373_v4, %v446_v24  ;;  %v422_v13 = vmax.f32 %v420_v8, %v421_v21  ;;  %v457_v18 = vsel %vm445_vm2, %v366_v9, %v456_v11 }
  0x64   : > { %v450_v28 = vsel %vm449_vm4, %v387_v10, %v448_v26  ;;  %v458_v30 = vsel %vm447_vm3, %v380_v16, %v457_v18 }
  0x65   : > { %v452_v29 = vsel %vm451_vm5, %v401_v20, %v450_v28  ;;  %v459_v12 = vsel %vm449_vm4, %v394_v19, %v458_v30 }
  0x66   : > { %v454_v32 = vsel %vm453_vm6, %v415_v22, %v452_v29  ;;  %v460_v17 = vsel %vm451_vm5, %v408_v25, %v459_v12  ;;  %471 = sbr.rel (%p702_p5) target bundleno = 396 (0x18c), region = 56 }
  0x67   : > { %v464_v33 = vmax.f32 %v423_v27, %v454_v32  ;;  %v461_v34 = vsel %vm453_vm6, %v422_v13, %v460_v17 }
  0x68   : > { %v465_v35 = vmax.f32 %v424_v31, %v461_v34 }
  0x69   : > { %466 = vst [vmem:[#allocation2] sm:$0xff] %v464_v33 }
  0x6a   : > { %467 = vst [vmem:[#allocation2 + $0x8] sm:$0xff] %v465_v35 }
  0x6b   : > { %v505_v23 = vld [vmem:[#allocation6 + $0xf8] sm:$0xff]  ;;  %v504_v37 = vld [vmem:[#allocation6 + $0xf0] sm:$0xff]  ;;  %v503_v39 = vld [vmem:[#allocation6 + $0xe8] sm:$0xff] }
  0x6c   : > { %v489_v36 = vld [vmem:[#allocation6 + $0x78] sm:$0xff]  ;;  %712 = vmatprep.subr.mxu0 %v505_v23  ;;  %v488_v38 = vld [vmem:[#allocation6 + $0x70] sm:$0xff]  ;;  %v487_v40 = vld [vmem:[#allocation6 + $0x68] sm:$0xff] }
  0x6d   : > { %713 = vmatpush3.msra.mxu0 %v489_v36  ;;  %v502_v41 = vld [vmem:[#allocation6 + $0xe0] sm:$0xff]  ;;  %v501_v43 = vld [vmem:[#allocation6 + $0xd8] sm:$0xff]  ;;  %v500_v45 = vld [vmem:[#allocation6 + $0xd0] sm:$0xff] }
  0x6e   : > { %714 = vmatprep.subr.mxu0 %v504_v37  ;;  %v486_v42 = vld [vmem:[#allocation6 + $0x60] sm:$0xff]  ;;  %v485_v44 = vld [vmem:[#allocation6 + $0x58] sm:$0xff]  ;;  %v484_v46 = vld [vmem:[#allocation6 + $0x50] sm:$0xff] }
  0x6f   : > { %715 = vmatpush3.msra.mxu0 %v488_v38  ;;  %v499_v47 = vld [vmem:[#allocation6 + $0xc8] sm:$0xff]  ;;  %v498_v50 = vld [vmem:[#allocation6 + $0xc0] sm:$0xff]  ;;  %v497_v52 = vld [vmem:[#allocation6 + $0xb8] sm:$0xff] }
  0x70   : > { %716 = vmatprep.subr.mxu0 %v503_v39  ;;  %v483_v49 = vld [vmem:[#allocation6 + $0x48] sm:$0xff]  ;;  %v482_v51 = vld [vmem:[#allocation6 + $0x40] sm:$0xff]  ;;  %v481_v53 = vld [vmem:[#allocation6 + $0x38] sm:$0xff] }
  0x71   : > { %717 = vmatpush3.msra.mxu0 %v487_v40  ;;  %v473_v48 = vld [vmem:[#allocation2 + $0x8] sm:$0xff]  ;;  %v496_v54 = vld [vmem:[#allocation6 + $0xb0] sm:$0xff]  ;;  %v495_v56 = vld [vmem:[#allocation6 + $0xa8] sm:$0xff] }
  0x72   : > { %718 = vmatprep.subr.mxu0 %v502_v41  ;;  %577 = vmatprep.mubr.f32.mxu0 %v473_v48  ;;  %v480_v55 = vld [vmem:[#allocation6 + $0x30] sm:$0xff]  ;;  %v479_v57 = vld [vmem:[#allocation6 + $0x28] sm:$0xff]  ;;  %v494_v58 = vld [vmem:[#allocation6 + $0xa0] sm:$0xff] }
  0x73   : > { %719 = vmatpush3.msra.mxu0 %v486_v42  ;;  %v478_v59 = vld [vmem:[#allocation6 + $0x20] sm:$0xff]  ;;  %v493_v60 = vld [vmem:[#allocation6 + $0x98] sm:$0xff]  ;;  %v492_v62 = vld [vmem:[#allocation6 + $0x90] sm:$0xff] }
  0x74   : > { %720 = vmatprep.subr.mxu0 %v501_v43  ;;  %v477_v61 = vld [vmem:[#allocation6 + $0x18] sm:$0xff]  ;;  %v476_v63 = vld [vmem:[#allocation6 + $0x10] sm:$0xff]  ;;  %v491_v0 = vld [vmem:[#allocation6 + $0x88] sm:$0xff] }
  0x75   : > { %721 = vmatpush3.msra.mxu0 %v485_v44  ;;  %v475_v2 = vld [vmem:[#allocation6 + $0x8] sm:$0xff]  ;;  %v490_v3 = vld [vmem:[#allocation6 + $0x80] sm:$0xff]  ;;  %v472_v5 = vld [vmem:[#allocation2] sm:$0xff] }
  0x76   : > { %722 = vmatprep.subr.mxu0 %v500_v45  ;;  %v474_v4 = vld [vmem:[#allocation6] sm:$0xff]  ;;  %v703_v8 = vld [vmem:[%s1155_s2] ss:$0 sm:$0xff] }
  0x77   : > { %723 = vmatpush3.msra.mxu0 %v484_v46  ;;  %v704_v31 = vld [vmem:[%s1156_s3] ss:$0 sm:$0xff] }
  0x78   : > { %724 = vmatprep.subr.mxu0 %v499_v47  ;;  %v705_v12 = vld [vmem:[%s1157_s4] ss:$0 sm:$0xff] }
  0x79   : > { %725 = vmatpush3.msra.mxu0 %v483_v49 }
  0x7a   : > { %726 = vmatprep.subr.mxu0 %v498_v50 }
  0x7b   : > { %727 = vmatpush3.msra.mxu0 %v482_v51 }
  0x7c   : > { %728 = vmatprep.subr.mxu0 %v497_v52 }
  0x7d   : > { %729 = vmatpush3.msra.mxu0 %v481_v53 }
  0x7e   : > { %730 = vmatprep.subr.mxu0 %v496_v54 }
  0x7f   : > { %731 = vmatpush3.msra.mxu0 %v480_v55 }
  0x80   : > { %732 = vmatprep.subr.mxu0 %v495_v56 }
  0x81   : > { %733 = vmatpush3.msra.mxu0 %v479_v57 }
  0x82   : > { %734 = vmatprep.subr.mxu0 %v494_v58 }
  0x83   : > { %735 = vmatpush3.msra.mxu0 %v478_v59 }
  0x84   : > { %736 = vmatprep.subr.mxu0 %v493_v60 }
  0x85   : > { %737 = vmatpush3.msra.mxu0 %v477_v61 }
  0x86   : > { %738 = vmatprep.subr.mxu0 %v492_v62 }
  0x87   : > { %739 = vmatpush3.msra.mxu0 %v476_v63 }
  0x88   : > { %740 = vmatprep.subr.mxu0 %v491_v0 }
  0x89   : > { %741 = vmatpush3.msra.mxu0 %v475_v2 }
  0x8a   : > { %742 = vmatprep.subr.mxu0 %v490_v3 }
  0x8b   : > { %743 = vmatpush3.msra.mxu0 %v474_v4 }
  0x8c   : > { %578 = vmatmul.mubr.f32.vlgmr.msra.gmra.mxu0 %v472_v5 }
 0x14c   : > { %v744_v6 = vpop.f32.mrf.mxu0 }
 0x14e   : > { %v745_v9 = vpop.f32.mrf.mxu0 }
 0x14f   : > { %v746_v10 = vadd.f32 %v745_v9, %v744_v6 }
 0x151   : > { %v580_v14 = vadd.f32 %v746_v10, %v703_v8 }
 0x153   : > { %v583_v15 = vrot.slane %v580_v14, 4 }
 0x155   : > { %v584_v16 = vadd.f32 %v583_v15, %v580_v14 }
 0x157   : > { %v585_v20 = vrot.slane %v584_v16, 2 }
 0x159   : > { %v586_v21 = vadd.f32 %v585_v20, %v584_v16 }
 0x15b   : > { %v587_v1 = vrot.slane %v586_v21, 1 }
 0x15d   : > { %v588_v19 = vadd.f32 %v587_v1, %v586_v21 }
 0x15f   : > { %v590_v22 = vmul.f32 0.125, %v588_v19 }
 0x161   : > { %v591_v24 = vsub.f32 %v580_v14, %v590_v22 }
 0x163   : > { %v592_v7 = vmul.f32 %v591_v24, %v591_v24 }
 0x165   : > { %v593_v25 = vrot.slane %v592_v7, 4 }
 0x167   : > { %v594_v26 = vadd.f32 %v593_v25, %v592_v7 }
 0x169   : > { %v595_v11 = vrot.slane %v594_v26, 2 }
 0x16b   : > { %v596_v13 = vadd.f32 %v595_v11, %v594_v26 }
 0x16d   : > { %v597_v27 = vrot.slane %v596_v13, 1 }
 0x16f   : > { %v598_v28 = vadd.f32 %v597_v27, %v596_v13 }
 0x171   : > { %v599_v18 = vmul.f32 0.125, %v598_v28 }
 0x173   : > { %v600_v29 = vadd.f32 1e-05, %v599_v18 }
 0x175   : > { %815 = vrsqrt.f32 %v600_v29 }
 0x182   : > { %v816_v30 = vpop.eup %815 }
 0x183   : > { %v602_v32 = vmul.f32 %v816_v30, %v591_v24 }
 0x185   : > { %v610_v17 = vmul.f32 %v704_v31, %v602_v32 }
 0x187   : > { %v618_v33 = vadd.f32 %v705_v12, %v610_v17 }
 0x189   : > { %v619_v34 = vmax.f32 %v618_v33, 0.0 }
 0x18b   : > { %620 = vst [vmem:[#allocation8] sm:$0xff] %v619_v34 }
 0x18c PF: > { %p770_p9 = scmp.eq.s32.totalorder %s971_s22, 1  ;;  %s921_s30 = smov [#allocation8]  }
 0x18d   : > { %s628_s6 = sshll.u32 %s921_s30, 4  ;;  %s629_s6 = int_to_ptr.vmem [resolvable:$true] %s628_s6 }
 0x18e   : > { %s843_s7 = scalar_lea.vmem %s629_s6, 128  ;;  %p850_p13 = scmp.lt.s32.totalorder %s629_s6, %s629_s6 }
 0x18f   : > { %p844_p10 = scmp.ne.s32.totalorder %s629_s6, %s843_s7  ;;  %p851_p0 = scmp.lt.s32.totalorder %s843_s7, %s843_s7 }
 0x191   : > { %p845_p11 = pnand %p844_p10, %p770_p9  ;;  %p852_p1 = por %p851_p0, %p850_p13 }
 0x193   : > { %p846_p12 = pneg %p845_p11 }
 0x195   : > { %p853_p2 = pnand %p852_p1, %p846_p12 }
 0x197   : > { %856 = shalt.err (!%p853_p2)
}
 0x198   : > { %761 = dma.vmem_to_hbm [thread:$0]  (%p770_p9), %s629_s6, 128, %s1158_s5, [#allocation5]  }
 0x199   : > { %892 = dma.done.wait (%p770_p9), [#allocation5], 128  }
 0x19a   : > { %894 = vsyncadd (%p770_p9), [#allocation5], 4294967168 }
 0x19b PF: > { %p17_p3 = scmp.ge.s32.totalorder %s974_s23, 4   ;;  %s1165_s18 = smov %s901_s19 }
 0x19c   : > { %s1166_s19 = smov %s905_s20  ;;  %s1167_s20 = smov %s984_s26 }
 0x19d   : > { %s1168_s21 = smov %s974_s23  ;;  %19 = sbr.rel (!%p17_p3) target bundleno = 5 (0x5), region = 94 }
 0x1a2   :  { %641 = vsyncpa [#allocation4], 1 }
 0x1a3   :  { %643 = vsyncpa [#allocation4 + $0x1], 1 }
 0x1a4   :  { %644 = vsyncpa [#allocation7], 1 }
 0x1a5   :  { %645 = vsyncpa [#allocation5], 1 }
 0x1a6   :  { %647 = vsyncpa [#allocation5 + $0x1], 1 }

</bundles_post_ra>
